<compile_context>
chip_gen: v7x
topology: tpu7x:2x2x1
jax: 0.10.0
libtpu: 0.0.40
codegen_flags: <defaults>
</compile_context>

<pallas_src>
import functools

import jax
import jax.numpy as jnp
from jax.experimental import pallas as pl
from jax.experimental.pallas import tpu as pltpu


def _round_up(x, m):
    return (x + m - 1) // m * m


def _vae_kernel(
    lat_dim, pad_lanes,
    x_ref, eps_ref,
    w_enc_ref, b_enc_ref,
    w_mulv_ref, b_mulv_ref,
    w_d1_ref, b_d1_ref,
    w_d2_ref, b_d2_ref,
    recon_ref, packed_ref,
):
    cd = x_ref.dtype  # matmul (MXU) compute dtype; accumulation is always f32

    # ---- encoder: Linear(in_dim, hid_dim) + ReLU (f32 elementwise) --------
    x = x_ref[...]
    h = jnp.dot(x, w_enc_ref[...], preferred_element_type=jnp.float32)
    h = jnp.maximum(h + b_enc_ref[...], 0.0)

    # ---- fused latent heads: one (hid, 2*lat) matmul -----------------------
    mulv = jnp.dot(h.astype(cd), w_mulv_ref[...],
                   preferred_element_type=jnp.float32)
    mulv = mulv + b_mulv_ref[...]
    mu = mulv[:, :lat_dim]
    lv = mulv[:, lat_dim:]

    # ---- reparameterize: z = mu + eps * exp(0.5 * logvar2) (f32, EUP exp) --
    z = mu + eps_ref[...] * jnp.exp(0.5 * lv)

    # ---- decoder: Linear(lat, hid) + ReLU, Linear(hid, in) + Sigmoid -------
    d1 = jnp.dot(z.astype(cd), w_d1_ref[...],
                 preferred_element_type=jnp.float32)
    d1 = jnp.maximum(d1 + b_d1_ref[...], 0.0)
    logits = jnp.dot(d1.astype(cd), w_d2_ref[...],
                     preferred_element_type=jnp.float32)
    logits = logits + b_d2_ref[...]

    # sigmoid via tanh identity -> EUP slot, f32 (numerically safe epilogue)
    recon_ref[...] = 0.5 * (jnp.tanh(0.5 * logits) + 1.0)

    # ---- lane-dense packed slab: [mu | logvar2 | z | zero-pad] -------------
    parts = [mu, lv, z]
    if pad_lanes > 0:
        parts.append(jnp.zeros((mu.shape[0], pad_lanes), jnp.float32))
    packed_ref[...] = jnp.concatenate(parts, axis=-1)


def vae_forward(x, eps, params, *, compute_dtype=jnp.bfloat16, max_batch_tile=256):
    """Full VAE forward in one Pallas kernel.

    x:   (B, C, H, W) float32, C*H*W == in_dim
    eps: (B, lat_dim) float32 standard-normal noise (reparameterization)
    Returns (recon, mu, logvar2, z) in float32.
    """
    B = x.shape[0]
    in_dim = params["w_enc"].shape[0]
    hid_dim = params["w_enc"].shape[1]
    lat_dim = params["w_mu"].shape[1]

    x2 = x.reshape(B, in_dim).astype(jnp.float32)
    eps_f = eps.astype(jnp.float32)

    # ---- batch tiling ------------------------------------------------------
    TB = min(max_batch_tile, _round_up(B, 8))
    padded_B = _round_up(B, TB)
    if padded_B != B:
        x2 = jnp.pad(x2, ((0, padded_B - B), (0, 0)))
        eps_f = jnp.pad(eps_f, ((0, padded_B - B), (0, 0)))
    grid = (padded_B // TB,)

    # ---- fuse mu / logvar2 heads, cast matmul operands to compute dtype ----
    w_mulv = jnp.concatenate([params["w_mu"], params["w_lv"]], axis=1)
    b_mulv = jnp.concatenate([params["b_mu"], params["b_lv"]], axis=1)

    cd = compute_dtype
    x_c = x2.astype(cd)
    w_enc = params["w_enc"].astype(cd)
    w_mulv_c = w_mulv.astype(cd)
    w_d1 = params["w_d1"].astype(cd)
    w_d2 = params["w_d2"].astype(cd)
    # biases stay f32 (added post-accumulation on the VPU)
    b_enc = params["b_enc"].astype(jnp.float32)
    b_mulv = b_mulv.astype(jnp.float32)
    b_d1 = params["b_d1"].astype(jnp.float32)
    b_d2 = params["b_d2"].astype(jnp.float32)

    packed_w = _round_up(3 * lat_dim, 128)
    pad_lanes = packed_w - 3 * lat_dim

    inputs = (x_c, eps_f, w_enc, b_enc, w_mulv_c, b_mulv, w_d1, b_d1, w_d2, b_d2)

    def batch_tiled(shape):
        return pl.BlockSpec((TB,) + shape[1:], lambda i: (i,) + (0,) * (len(shape) - 1))

    def resident(shape):  # weights / biases: DMA'd once, constant index_map
        return pl.BlockSpec(shape, lambda i: tuple(0 for _ in shape))

    in_specs = [
        batch_tiled(x_c.shape),
        batch_tiled(eps_f.shape),
        resident(w_enc.shape), resident(b_enc.shape),
        resident(w_mulv_c.shape), resident(b_mulv.shape),
        resident(w_d1.shape), resident(b_d1.shape),
        resident(w_d2.shape), resident(b_d2.shape),
    ]

    out_shapes = (
        jax.ShapeDtypeStruct((padded_B, in_dim), jnp.float32),    # recon
        jax.ShapeDtypeStruct((padded_B, packed_w), jnp.float32),  # mu|lv|z packed
    )
    out_specs = [
        batch_tiled((padded_B, in_dim)),
        batch_tiled((padded_B, packed_w)),
    ]

    # ---- advisory cost estimate --------------------------------------------
    flops = 2 * padded_B * (in_dim * hid_dim + hid_dim * 2 * lat_dim
                            + lat_dim * hid_dim + hid_dim * in_dim)
    transcendentals = padded_B * (lat_dim + in_dim)  # exp (reparam) + tanh (sigmoid)
    bytes_accessed = sum(int(a.size) * a.dtype.itemsize for a in inputs) + sum(
        int(jnp.prod(jnp.array(s.shape))) * 4 for s in out_shapes)
    cost = pl.CostEstimate(flops=flops, transcendentals=transcendentals,
                           bytes_accessed=int(bytes_accessed))

    grid_spec = pltpu.PrefetchScalarGridSpec(
        num_scalar_prefetch=0,
        grid=grid,
        in_specs=in_specs,
        out_specs=out_specs,
        scratch_shapes=[],
    )

    recon_p, packed = pl.pallas_call(
        functools.partial(_vae_kernel, lat_dim, pad_lanes),
        out_shape=out_shapes,
        grid_spec=grid_spec,
        compiler_params=pltpu.CompilerParams(
            dimension_semantics=("parallel",),
            vmem_limit_bytes=48 * 1024 * 1024,
        ),
        cost_estimate=cost,
    )(*inputs)

    recon = recon_p[:B]
    mu = packed[:B, :lat_dim]
    lv = packed[:B, lat_dim:2 * lat_dim]
    z = packed[:B, 2 * lat_dim:3 * lat_dim]
    return recon, mu, lv, z


def init_params(key, in_dim, hid_dim, lat_dim):
    """Deterministic synthetic initialization (not a checkpoint load)."""
    ks = jax.random.split(key, 10)

    def lin(kw, kb, fan_in, fan_out):
        bound = 1.0 / jnp.sqrt(fan_in)
        w = jax.random.uniform(kw, (fan_in, fan_out), jnp.float32, -bound, bound)
        b = jax.random.uniform(kb, (1, fan_out), jnp.float32, -bound, bound)
        return w, b

    w_enc, b_enc = lin(ks[0], ks[1], in_dim, hid_dim)
    w_mu, b_mu = lin(ks[2], ks[3], hid_dim, lat_dim)
    w_lv, b_lv = lin(ks[4], ks[5], hid_dim, lat_dim)
    w_d1, b_d1 = lin(ks[6], ks[7], lat_dim, hid_dim)
    w_d2, b_d2 = lin(ks[8], ks[9], hid_dim, in_dim)
    return dict(
        w_enc=w_enc, b_enc=b_enc,
        w_mu=w_mu, b_mu=b_mu,
        w_lv=w_lv, b_lv=b_lv,
        w_d1=w_d1, b_d1=b_d1,
        w_d2=w_d2, b_d2=b_d2,
    )


def vae_forward_ref(x, eps, params):
    """Pure-JAX reference (matches the PyTorch module forward)."""
    B = x.shape[0]
    in_dim = params["w_enc"].shape[0]
    x2 = x.reshape(B, in_dim)
    h = jnp.maximum(x2 @ params["w_enc"] + params["b_enc"], 0.0)
    mu = h @ params["w_mu"] + params["b_mu"]
    lv = h @ params["w_lv"] + params["b_lv"]
    z = mu + eps * jnp.exp(0.5 * lv)
    d1 = jnp.maximum(z @ params["w_d1"] + params["b_d1"], 0.0)
    recon = jax.nn.sigmoid(d1 @ params["w_d2"] + params["b_d2"])
    return recon, mu, lv, z


if __name__ == "__main__":
    # Small shapes consistent with the module: in_dim = C*H*W = 1*16*16 = 256,
    # hid_dim = 128, lat_dim = 32, batch = 8.
    B, C, H, W = 8, 1, 16, 16
    in_dim, hid_dim, lat_dim = C * H * W, 128, 32

    key = jax.random.PRNGKey(0)
    k_params, k_x, k_eps = jax.random.split(key, 3)

    params = init_params(k_params, in_dim, hid_dim, lat_dim)
    x = jax.random.uniform(k_x, (B, C, H, W), jnp.float32)       # NCHW input
    eps = jax.random.normal(k_eps, (B, lat_dim), jnp.float32)    # torch.randn equivalent

    r_ref, mu_ref, lv_ref, z_ref = vae_forward_ref(x, eps, params)

    # ---- f32 matmul path: tight tolerance check ---------------------------
    recon, mu, lv, z = jax.block_until_ready(
        vae_forward(x, eps, params, compute_dtype=jnp.float32))
    assert recon.shape == (B, in_dim) and mu.shape == (B, lat_dim)
    assert jnp.allclose(recon, r_ref, atol=2e-5)
    assert jnp.allclose(mu, mu_ref, atol=2e-5)
    assert jnp.allclose(lv, lv_ref, atol=2e-5)
    assert jnp.allclose(z, z_ref, atol=2e-5)

    # ---- bf16 matmul path (f32 accumulation / elementwise): loose check ----
    recon_b, mu_b, lv_b, z_b = jax.block_until_ready(
        vae_forward(x, eps, params, compute_dtype=jnp.bfloat16))
    assert jnp.all(jnp.isfinite(recon_b)) and jnp.all(jnp.isfinite(z_b))
    assert jnp.allclose(recon_b, r_ref, atol=2e-1)
    assert jnp.allclose(mu_b, mu_ref, atol=2e-1)
    assert jnp.allclose(lv_b, lv_ref, atol=2e-1)
    assert jnp.allclose(z_b, z_ref, atol=2e-1)

    print("KERNEL_OK")
</pallas_src>

<mosaic_0001>
module attributes {stable_mosaic.version = 11 : i64} {
  func.func @_vae_kernel(%arg0: i32, %arg1: memref<8x256xf32, #tpu.memory_space<vmem>>, %arg2: memref<8x32xf32, #tpu.memory_space<vmem>>, %arg3: memref<256x128xf32, #tpu.memory_space<vmem>>, %arg4: memref<1x128xf32, #tpu.memory_space<vmem>>, %arg5: memref<128x64xf32, #tpu.memory_space<vmem>>, %arg6: memref<1x64xf32, #tpu.memory_space<vmem>>, %arg7: memref<32x128xf32, #tpu.memory_space<vmem>>, %arg8: memref<1x128xf32, #tpu.memory_space<vmem>>, %arg9: memref<128x256xf32, #tpu.memory_space<vmem>>, %arg10: memref<1x256xf32, #tpu.memory_space<vmem>>, %arg11: memref<8x256xf32, #tpu.memory_space<vmem>>, %arg12: memref<8x128xf32, #tpu.memory_space<vmem>>) attributes {dimension_semantics = [#tpu.dimension_semantics<parallel>], iteration_bounds = array<i64: 1>, scalar_prefetch = 0 : i64, scratch_operands = 0 : i64, tpu.core_type = #tpu.core_type<tc>, window_params = [{transform_indices = @transform_0, window_bounds = array<i64: 8, 256>}, {transform_indices = @transform_1, window_bounds = array<i64: 8, 32>}, {pipeline_mode = #tpu.pipeline_mode<synchronous>, transform_indices = @transform_2, window_bounds = array<i64: 256, 128>}, {pipeline_mode = #tpu.pipeline_mode<synchronous>, transform_indices = @transform_3, window_bounds = array<i64: 1, 128>}, {pipeline_mode = #tpu.pipeline_mode<synchronous>, transform_indices = @transform_4, window_bounds = array<i64: 128, 64>}, {pipeline_mode = #tpu.pipeline_mode<synchronous>, transform_indices = @transform_5, window_bounds = array<i64: 1, 64>}, {pipeline_mode = #tpu.pipeline_mode<synchronous>, transform_indices = @transform_6, window_bounds = array<i64: 32, 128>}, {pipeline_mode = #tpu.pipeline_mode<synchronous>, transform_indices = @transform_7, window_bounds = array<i64: 1, 128>}, {pipeline_mode = #tpu.pipeline_mode<synchronous>, transform_indices = @transform_8, window_bounds = array<i64: 128, 256>}, {pipeline_mode = #tpu.pipeline_mode<synchronous>, transform_indices = @transform_9, window_bounds = array<i64: 1, 256>}, {transform_indices = @transform_10, window_bounds = array<i64: 8, 256>}, {transform_indices = @transform_11, window_bounds = array<i64: 8, 128>}]} {
    %c0 = arith.constant 0 : index
    %c0_0 = arith.constant 0 : index
    %0 = vector.load %arg1[%c0, %c0_0] : memref<8x256xf32, #tpu.memory_space<vmem>>, vector<8x256xf32>
    %c0_1 = arith.constant 0 : index
    %c0_2 = arith.constant 0 : index
    %1 = vector.load %arg3[%c0_1, %c0_2] : memref<256x128xf32, #tpu.memory_space<vmem>>, vector<256x128xf32>
    %cst = arith.constant dense<0.000000e+00> : vector<8x128xf32>
    %2 = tpu.matmul %0, %1, %cst {dimension_numbers = #tpu.dot_dimension_numbers<[1], [0], [0], [1], [0, 0, 1, 1], [], []>} : vector<8x256xf32>, vector<256x128xf32>, vector<8x128xf32> -> vector<8x128xf32>
    %c0_3 = arith.constant 0 : index
    %c0_4 = arith.constant 0 : index
    %3 = vector.load %arg4[%c0_3, %c0_4] : memref<1x128xf32, #tpu.memory_space<vmem>>, vector<1x128xf32>
    %4 = vector.broadcast %3 : vector<1x128xf32> to vector<8x128xf32>
    %5 = arith.addf %2, %4 : vector<8x128xf32>
    %cst_5 = arith.constant 0.000000e+00 : f32
    %6 = vector.broadcast %cst_5 : f32 to vector<8x128xf32>
    %7 = arith.maximumf %5, %6 : vector<8x128xf32>
    %c0_6 = arith.constant 0 : index
    %c0_7 = arith.constant 0 : index
    %8 = vector.load %arg5[%c0_6, %c0_7] : memref<128x64xf32, #tpu.memory_space<vmem>>, vector<128x64xf32>
    %cst_8 = arith.constant dense<0.000000e+00> : vector<8x64xf32>
    %9 = tpu.matmul %7, %8, %cst_8 {dimension_numbers = #tpu.dot_dimension_numbers<[1], [0], [0], [1], [0, 0, 1, 1], [], []>} : vector<8x128xf32>, vector<128x64xf32>, vector<8x64xf32> -> vector<8x64xf32>
    %c0_9 = arith.constant 0 : index
    %c0_10 = arith.constant 0 : index
    %10 = vector.load %arg6[%c0_9, %c0_10] : memref<1x64xf32, #tpu.memory_space<vmem>>, vector<1x64xf32>
    %11 = vector.broadcast %10 : vector<1x64xf32> to vector<8x64xf32>
    %12 = arith.addf %9, %11 : vector<8x64xf32>
    %13 = vector.extract_strided_slice %12 {offsets = [0, 0], sizes = [8, 32], strides = [1, 1]} : vector<8x64xf32> to vector<8x32xf32>
    %14 = vector.extract_strided_slice %12 {offsets = [0, 32], sizes = [8, 32], strides = [1, 1]} : vector<8x64xf32> to vector<8x32xf32>
    %c0_11 = arith.constant 0 : index
    %c0_12 = arith.constant 0 : index
    %15 = vector.load %arg2[%c0_11, %c0_12] : memref<8x32xf32, #tpu.memory_space<vmem>>, vector<8x32xf32>
    %cst_13 = arith.constant 5.000000e-01 : f32
    %16 = vector.broadcast %cst_13 : f32 to vector<8x32xf32>
    %17 = arith.mulf %16, %14 : vector<8x32xf32>
    %18 = math.exp %17 : vector<8x32xf32>
    %19 = arith.mulf %15, %18 : vector<8x32xf32>
    %20 = arith.addf %13, %19 : vector<8x32xf32>
    %c0_14 = arith.constant 0 : index
    %c0_15 = arith.constant 0 : index
    %21 = vector.load %arg7[%c0_14, %c0_15] : memref<32x128xf32, #tpu.memory_space<vmem>>, vector<32x128xf32>
    %cst_16 = arith.constant dense<0.000000e+00> : vector<8x128xf32>
    %22 = tpu.matmul %20, %21, %cst_16 {dimension_numbers = #tpu.dot_dimension_numbers<[1], [0], [0], [1], [0, 0, 1, 1], [], []>} : vector<8x32xf32>, vector<32x128xf32>, vector<8x128xf32> -> vector<8x128xf32>
    %c0_17 = arith.constant 0 : index
    %c0_18 = arith.constant 0 : index
    %23 = vector.load %arg8[%c0_17, %c0_18] : memref<1x128xf32, #tpu.memory_space<vmem>>, vector<1x128xf32>
    %24 = vector.broadcast %23 : vector<1x128xf32> to vector<8x128xf32>
    %25 = arith.addf %22, %24 : vector<8x128xf32>
    %cst_19 = arith.constant 0.000000e+00 : f32
    %26 = vector.broadcast %cst_19 : f32 to vector<8x128xf32>
    %27 = arith.maximumf %25, %26 : vector<8x128xf32>
    %c0_20 = arith.constant 0 : index
    %c0_21 = arith.constant 0 : index
    %28 = vector.load %arg9[%c0_20, %c0_21] : memref<128x256xf32, #tpu.memory_space<vmem>>, vector<128x256xf32>
    %cst_22 = arith.constant dense<0.000000e+00> : vector<8x256xf32>
    %29 = tpu.matmul %27, %28, %cst_22 {dimension_numbers = #tpu.dot_dimension_numbers<[1], [0], [0], [1], [0, 0, 1, 1], [], []>} : vector<8x128xf32>, vector<128x256xf32>, vector<8x256xf32> -> vector<8x256xf32>
    %c0_23 = arith.constant 0 : index
    %c0_24 = arith.constant 0 : index
    %30 = vector.load %arg10[%c0_23, %c0_24] : memref<1x256xf32, #tpu.memory_space<vmem>>, vector<1x256xf32>
    %31 = vector.broadcast %30 : vector<1x256xf32> to vector<8x256xf32>
    %32 = arith.addf %29, %31 : vector<8x256xf32>
    %cst_25 = arith.constant 5.000000e-01 : f32
    %33 = vector.broadcast %cst_25 : f32 to vector<8x256xf32>
    %34 = arith.mulf %33, %32 : vector<8x256xf32>
    %35 = math.tanh %34 : vector<8x256xf32>
    %cst_26 = arith.constant 1.000000e+00 : f32
    %36 = vector.broadcast %cst_26 : f32 to vector<8x256xf32>
    %37 = arith.addf %35, %36 : vector<8x256xf32>
    %cst_27 = arith.constant 5.000000e-01 : f32
    %38 = vector.broadcast %cst_27 : f32 to vector<8x256xf32>
    %39 = arith.mulf %38, %37 : vector<8x256xf32>
    %c0_28 = arith.constant 0 : index
    %c0_29 = arith.constant 0 : index
    %40 = vector.load %arg11[%c0_28, %c0_29] : memref<8x256xf32, #tpu.memory_space<vmem>>, vector<8x256xf32>
    tpu.vector_store %arg11[%c0_28, %c0_29], %39 {strides = array<i32>} : memref<8x256xf32, #tpu.memory_space<vmem>>, vector<8x256xf32>,
    %cst_30 = arith.constant 0.000000e+00 : f32
    %41 = vector.broadcast %cst_30 : f32 to vector<8x32xf32>
    %42 = tpu.concatenate %13, %14, %20, %41 in 1 : vector<8x32xf32>, vector<8x32xf32>, vector<8x32xf32>, vector<8x32xf32> -> vector<8x128xf32>
    %c0_31 = arith.constant 0 : index
    %c0_32 = arith.constant 0 : index
    %43 = vector.load %arg12[%c0_31, %c0_32] : memref<8x128xf32, #tpu.memory_space<vmem>>, vector<8x128xf32>
    tpu.vector_store %arg12[%c0_31, %c0_32], %42 {strides = array<i32>} : memref<8x128xf32, #tpu.memory_space<vmem>>, vector<8x128xf32>,
    return
  }
  func.func @transform_0(%arg0: i32) -> (i32, i32) {
    %c0_i32 = arith.constant 0 : i32
    %c0_i32_0 = arith.constant 0 : i32
    return %arg0, %c0_i32 : i32, i32
  }
  func.func @transform_1(%arg0: i32) -> (i32, i32) {
    %c0_i32 = arith.constant 0 : i32
    %c0_i32_0 = arith.constant 0 : i32
    return %arg0, %c0_i32 : i32, i32
  }
  func.func @transform_2(%arg0: i32) -> (i32, i32) {
    %c0_i32 = arith.constant 0 : i32
    %c0_i32_0 = arith.constant 0 : i32
    %c0_i32_1 = arith.constant 0 : i32
    return %c0_i32, %c0_i32_0 : i32, i32
  }
  func.func @transform_3(%arg0: i32) -> (i32, i32) {
    %c0_i32 = arith.constant 0 : i32
    %c0_i32_0 = arith.constant 0 : i32
    %c0_i32_1 = arith.constant 0 : i32
    return %c0_i32, %c0_i32_0 : i32, i32
  }
  func.func @transform_4(%arg0: i32) -> (i32, i32) {
    %c0_i32 = arith.constant 0 : i32
    %c0_i32_0 = arith.constant 0 : i32
    %c0_i32_1 = arith.constant 0 : i32
    return %c0_i32, %c0_i32_0 : i32, i32
  }
  func.func @transform_5(%arg0: i32) -> (i32, i32) {
    %c0_i32 = arith.constant 0 : i32
    %c0_i32_0 = arith.constant 0 : i32
    %c0_i32_1 = arith.constant 0 : i32
    return %c0_i32, %c0_i32_0 : i32, i32
  }
  func.func @transform_6(%arg0: i32) -> (i32, i32) {
    %c0_i32 = arith.constant 0 : i32
    %c0_i32_0 = arith.constant 0 : i32
    %c0_i32_1 = arith.constant 0 : i32
    return %c0_i32, %c0_i32_0 : i32, i32
  }
  func.func @transform_7(%arg0: i32) -> (i32, i32) {
    %c0_i32 = arith.constant 0 : i32
    %c0_i32_0 = arith.constant 0 : i32
    %c0_i32_1 = arith.constant 0 : i32
    return %c0_i32, %c0_i32_0 : i32, i32
  }
  func.func @transform_8(%arg0: i32) -> (i32, i32) {
    %c0_i32 = arith.constant 0 : i32
    %c0_i32_0 = arith.constant 0 : i32
    %c0_i32_1 = arith.constant 0 : i32
    return %c0_i32, %c0_i32_0 : i32, i32
  }
  func.func @transform_9(%arg0: i32) -> (i32, i32) {
    %c0_i32 = arith.constant 0 : i32
    %c0_i32_0 = arith.constant 0 : i32
    %c0_i32_1 = arith.constant 0 : i32
    return %c0_i32, %c0_i32_0 : i32, i32
  }
  func.func @transform_10(%arg0: i32) -> (i32, i32) {
    %c0_i32 = arith.constant 0 : i32
    %c0_i32_0 = arith.constant 0 : i32
    return %arg0, %c0_i32 : i32, i32
  }
  func.func @transform_11(%arg0: i32) -> (i32, i32) {
    %c0_i32 = arith.constant 0 : i32
    %c0_i32_0 = arith.constant 0 : i32
    return %arg0, %c0_i32 : i32, i32
  }
}

</mosaic_0001>

<bundles_post_ra>
// kernel: tpu_custom_call.1
= control target key start
LH: loop header
LB: loop body
LE: loop exit
PB: predicated region body
PF: predicated region fallthrough
CT: control target
= control target key end

     0   :  { %17 = vsyncpa [#allocation3], 0  ;;  %s1064_s0 = inlined_call_operand.vmem [shape: f32[8,256], index: 0, kind: input, shape index: {}]   ;;  %s1065_s1 = inlined_call_operand.vmem [shape: f32[8,32], index: 1, kind: input, shape index: {}]   ;;  %s1066_s2 = inlined_call_operand.hbm [shape: f32[256,128], index: 2, kind: input, shape index: {}]   ;;  %s1067_s3 = inlined_call_operand.vmem [shape: f32[1,128], index: 3, kind: input, shape index: {}]   ;;  %s1068_s4 = inlined_call_operand.vmem [shape: f32[128,64], index: 4, kind: input, shape index: {}]   ;;  %s1069_s5 = inlined_call_operand.vmem [shape: f32[1,64], index: 5, kind: input, shape index: {}]   ;;  %s1070_s6 = inlined_call_operand.vmem [shape: f32[32,128], index: 6, kind: input, shape index: {}]   ;;  %s1071_s7 = inlined_call_operand.vmem [shape: f32[1,128], index: 7, kind: input, shape index: {}]   ;;  %s1072_s8 = inlined_call_operand.hbm [shape: f32[128,256], index: 8, kind: input, shape index: {}]   ;;  %s1073_s9 = inlined_call_operand.vmem [shape: f32[1,256], index: 9, kind: input, shape index: {}]   ;;  %s1074_s10 = inlined_call_operand.hbm [shape: f32[8,256], index: 10, kind: output, shape index: {0}]   ;;  %s1075_s11 = inlined_call_operand.hbm [shape: f32[8,128], index: 11, kind: output, shape index: {1}]  }
   0x1   :  { %18 = vsyncpa [#allocation6], 0 }
   0x2   :  { %19 = vsyncpa [#allocation4], 0 }
   0x3   :  { %20 = vsyncpa [#allocation9], 0  ;;  %s847_s17 = smov [#allocation2]   ;;  %s751_s21 = scalar_lea.hbm %s1066_s2, 4096 }
   0x4   :  { %s30_s18 = sshll.u32 %s847_s17, 4  ;;  %p752_p0 = scmp.ne.s32.totalorder %s1066_s2, %s751_s21  ;;  %s31_s18 = int_to_ptr.vmem [resolvable:$true] %s30_s18 }
   0x5   :  { %p755_p1 = scmp.lt.u32.totalorder %s751_s21, %s1066_s2 }
   0x7   :  { %p757_p2 = pnand %p755_p1, %p752_p0 }
   0x9   :  { %760 = shalt.err (!%p757_p2)
}
   0xa   :  { %s761_s26 = scalar_lea.vmem %s31_s18, 4096  ;;  %p766_p4 = scmp.lt.s32.totalorder %s31_s18, %s31_s18 }
   0xb   :  { %p762_p3 = scmp.ne.s32.totalorder %s31_s18, %s761_s26  ;;  %p767_p5 = scmp.lt.s32.totalorder %s761_s26, %s761_s26 }
   0xd   :  { %p768_p6 = por %p767_p5, %p766_p4 }
   0xf   :  { %p769_p7 = pnand %p768_p6, %p762_p3 }
  0x11   :  { %772 = shalt.err (!%p769_p7)
}
  0x12   :  { %s848_s27 = smov 128   ;;  %s849_s28 = smov 8  }
  0x13   :  { %36 = dma.hbm_to_vmem [thread:$0]  %s1066_s2, 4096, %s31_s18, [#allocation3], %s848_s27, %s848_s27, %s849_s28  }
  0x14   :  { %s850_s12 = smov [#allocation5]   ;;  %s773_s16 = scalar_lea.hbm %s1072_s8, 4096 }
  0x15   :  { %s52_s13 = sshll.u32 %s850_s12, 4  ;;  %p774_p8 = scmp.ne.s32.totalorder %s1072_s8, %s773_s16  ;;  %s53_s13 = int_to_ptr.vmem [resolvable:$true] %s52_s13 }
  0x16   :  { %p777_p9 = scmp.lt.u32.totalorder %s773_s16, %s1072_s8 }
  0x18   :  { %p779_p10 = pnand %p777_p9, %p774_p8 }
  0x1a   :  { %782 = shalt.err (!%p779_p10)
}
  0x1b   :  { %s783_s22 = scalar_lea.vmem %s53_s13, 4096  ;;  %p788_p12 = scmp.lt.s32.totalorder %s53_s13, %s53_s13 }
  0x1c   :  { %p784_p11 = scmp.ne.s32.totalorder %s53_s13, %s783_s22  ;;  %p789_p13 = scmp.lt.s32.totalorder %s783_s22, %s783_s22 }
  0x1e   :  { %p790_p0 = por %p789_p13, %p788_p12 }
  0x20   :  { %p791_p1 = pnand %p790_p0, %p784_p11 }
  0x22   :  { %794 = shalt.err (!%p791_p1)
}
  0x23   :  { %s851_s2 = smov 256   ;;  %s852_s18 = smov 16  }
  0x24   :  { %58 = dma.hbm_to_vmem [thread:$0]  %s1072_s8, 4096, %s53_s13, [#allocation6], %s851_s2, %s851_s2, %s852_s18  }
  0x25   :  { %839 = dma.done.wait [#allocation3], 4096  }
  0x26   :  { %840 = vsyncadd [#allocation3], 4294963200 }
  0x27   :  { %841 = dma.done.wait [#allocation6], 4096  }
  0x28   :  { %842 = vsyncadd [#allocation6], 4294963200  ;;  %v853_v0 = vmov 0.0|0.0   ;;  %v85_v1 = vld [vmem:[#allocation2 + $0x80] sm:$0xff]  ;;  %v86_v2 = vld [vmem:[#allocation2 + $0x88] sm:$0xff]  ;;  %vm854_vm0 = vmmov 0  }
  0x29   :  { %670 = vmatprep.subr.bf16.mxu1 %v853_v0  ;;  %v69_v3 = vld [vmem:[#allocation2] sm:$0xff]  ;;  %v638_v4 = vpack.c.bf16 %v86_v2, %v85_v1  ;;  %v70_v5 = vld [vmem:[#allocation2 + $0x8] sm:$0xff]  ;;  %v87_v6 = vld [vmem:[#allocation2 + $0x90] sm:$0xff]  ;;  %vm293_vm1 = vcmask 261120   ;;  %s857_s28 = smov 64   ;;  %vm496_vm2 = vcmask 523264  }
  0x2a   :  { %v88_v7 = vld [vmem:[#allocation2 + $0x98] sm:$0xff]  ;;  %v640_v8 = vpack.c.bf16 %v70_v5, %v69_v3  ;;  %v71_v10 = vld [vmem:[#allocation2 + $0x10] sm:$0xff]  ;;  %v89_v12 = vld [vmem:[#allocation2 + $0xa0] sm:$0xff]  ;;  %vm498_vm3 = vcmask 785408   ;;  %s858_s30 = smov [#allocation8]  }
  0x2b   :  { %v642_v9 = vpack.c.bf16 %v88_v7, %v87_v6  ;;  %v72_v11 = vld [vmem:[#allocation2 + $0x18] sm:$0xff]  ;;  %639 = vmatprep.subr.bf16.mxu0 %v638_v4  ;;  %v90_v13 = vld [vmem:[#allocation2 + $0xa8] sm:$0xff]  ;;  %v73_v16 = vld [vmem:[#allocation2 + $0x20] sm:$0xff]  ;;  %s517_s12 = sshll.u32 %s858_s30, 4  ;;  %s518_s12 = int_to_ptr.vmem [resolvable:$true] %s517_s12 }
  0x2c   :  { %641 = vmatpush3.bf16.msra.mxu0 %v640_v8  ;;  %v644_v14 = vpack.c.bf16 %v72_v11, %v71_v10  ;;  %v646_v15 = vpack.c.bf16 %v90_v13, %v89_v12  ;;  %v74_v17 = vld [vmem:[#allocation2 + $0x28] sm:$0xff]  ;;  %v91_v18 = vld [vmem:[#allocation2 + $0xb0] sm:$0xff]  ;;  %v92_v19 = vld [vmem:[#allocation2 + $0xb8] sm:$0xff]  ;;  %v855_v12 = vmov 0.0   ;;  %s795_s13 = scalar_lea.vmem %s518_s12, 128  ;;  %p800_p3 = scmp.lt.s32.totalorder %s518_s12, %s518_s12 }
  0x2d   :  { %643 = vmatprep.subr.bf16.mxu0 %v642_v9  ;;  %v648_v20 = vpack.c.bf16 %v74_v17, %v73_v16  ;;  %v650_v21 = vpack.c.bf16 %v92_v19, %v91_v18  ;;  %v75_v22 = vld [vmem:[#allocation2 + $0x30] sm:$0xff]  ;;  %v76_v23 = vld [vmem:[#allocation2 + $0x38] sm:$0xff]  ;;  %v93_v24 = vld [vmem:[#allocation2 + $0xc0] sm:$0xff]  ;;  %624 = vmatprep.mubr.msk.f32.mxu1 %vm854_vm0, %v855_v12  ;;  %p796_p2 = scmp.ne.s32.totalorder %s518_s12, %s795_s13  ;;  %p801_p4 = scmp.lt.s32.totalorder %s795_s13, %s795_s13 }
  0x2e   :  { %v94_v25 = vld [vmem:[#allocation2 + $0xc8] sm:$0xff]  ;;  %v179_v27 = vld [vmem:[%s1068_s4] sm:$0xff]  ;;  %v652_v29 = vpack.c.bf16 %v76_v23, %v75_v22  ;;  %v181_v31 = vld [vmem:[%s1068_s4 + $0x10] sm:$0xff] }
  0x2f   :  { %v68_v26 = vld [vmem:[%s1064_s0 + $0x8] sm:$0xff]  ;;  %v182_v32 = vld [vmem:[%s1068_s4 + $0x18] sm:$0xff]  ;;  %v654_v33 = vpack.c.bf16 %v94_v25, %v93_v24  ;;  %v77_v34 = vld [vmem:[#allocation2 + $0x40] sm:$0xff]  ;;  %p802_p5 = por %p801_p4, %p800_p3 }
  0x30   :  { %645 = vmatpush3.bf16.msra.mxu0 %v644_v14  ;;  %172 = vmatprep.mubr.f32.mxu0 %v68_v26  ;;  %v180_v28 = vld [vmem:[%s1068_s4 + $0x8] sm:$0xff]  ;;  %v95_v36 = vld [vmem:[#allocation2 + $0xd0] sm:$0xff]  ;;  %v96_v37 = vld [vmem:[#allocation2 + $0xd8] sm:$0xff]  ;;  %v674_v38 = vpack.c.bf16 %v182_v32, %v181_v31 }
  0x31   :  { %647 = vmatprep.subr.bf16.mxu0 %v646_v15  ;;  %v671_v30 = vpack.c.bf16 %v180_v28, %v179_v27  ;;  %v78_v35 = vld [vmem:[#allocation2 + $0x48] sm:$0xff]  ;;  %v183_v39 = vld [vmem:[%s1068_s4 + $0x20] sm:$0xff]  ;;  %v658_v42 = vpack.c.bf16 %v96_v37, %v95_v36  ;;  %v79_v43 = vld [vmem:[#allocation2 + $0x50] sm:$0xff]  ;;  %p803_p6 = pnand %p802_p5, %p796_p2 }
  0x32   :  { %v184_v40 = vld [vmem:[%s1068_s4 + $0x28] sm:$0xff]  ;;  %v656_v41 = vpack.c.bf16 %v78_v35, %v77_v34  ;;  %v80_v44 = vld [vmem:[#allocation2 + $0x58] sm:$0xff]  ;;  %v97_v45 = vld [vmem:[#allocation2 + $0xe0] sm:$0xff] }
  0x33   :  { %672 = vmatpush3.bf16.msra.mxu1 %v671_v30  ;;  %v98_v46 = vld [vmem:[#allocation2 + $0xe8] sm:$0xff]  ;;  %v677_v47 = vpack.c.bf16 %v184_v40, %v183_v39  ;;  %v185_v48 = vld [vmem:[%s1068_s4 + $0x30] sm:$0xff]  ;;  %v186_v49 = vld [vmem:[%s1068_s4 + $0x38] sm:$0xff]  ;;  %v660_v50 = vpack.c.bf16 %v80_v44, %v79_v43 }
  0x34   :  { %649 = vmatpush3.bf16.msra.mxu0 %v648_v20  ;;  %673 = vmatprep.subr.bf16.mxu1 %v853_v0  ;;  %v662_v51 = vpack.c.bf16 %v98_v46, %v97_v45  ;;  %v81_v52 = vld [vmem:[#allocation2 + $0x60] sm:$0xff]  ;;  %v82_v53 = vld [vmem:[#allocation2 + $0x68] sm:$0xff]  ;;  %v99_v54 = vld [vmem:[#allocation2 + $0xf0] sm:$0xff]  ;;  %v680_v56 = vpack.c.bf16 %v186_v49, %v185_v48 }
  0x35   :  { %651 = vmatprep.subr.bf16.mxu0 %v650_v21  ;;  %v100_v55 = vld [vmem:[#allocation2 + $0xf8] sm:$0xff]  ;;  %v187_v57 = vld [vmem:[%s1068_s4 + $0x40] sm:$0xff]  ;;  %v188_v58 = vld [vmem:[%s1068_s4 + $0x48] sm:$0xff]  ;;  %v664_v59 = vpack.c.bf16 %v82_v53, %v81_v52 }
  0x36   :  { %v666_v60 = vpack.c.bf16 %v100_v55, %v99_v54  ;;  %v83_v61 = vld [vmem:[#allocation2 + $0x70] sm:$0xff]  ;;  %v84_v62 = vld [vmem:[#allocation2 + $0x78] sm:$0xff]  ;;  %v683_v63 = vpack.c.bf16 %v188_v58, %v187_v57  ;;  %v67_v5 = vld [vmem:[%s1064_s0] sm:$0xff] }
  0x37   :  { %675 = vmatpush3.bf16.msra.mxu1 %v674_v38  ;;  %v189_v1 = vld [vmem:[%s1068_s4 + $0x50] sm:$0xff]  ;;  %v190_v2 = vld [vmem:[%s1068_s4 + $0x58] sm:$0xff]  ;;  %v668_v3 = vpack.c.bf16 %v84_v62, %v83_v61  ;;  %v191_v6 = vld [vmem:[%s1068_s4 + $0x60] sm:$0xff] }
  0x38   :  { %653 = vmatpush3.bf16.msra.mxu0 %v652_v29  ;;  %676 = vmatprep.subr.bf16.mxu1 %v853_v0  ;;  %v686_v4 = vpack.c.bf16 %v190_v2, %v189_v1  ;;  %v192_v7 = vld [vmem:[%s1068_s4 + $0x68] sm:$0xff]  ;;  %v193_v9 = vld [vmem:[%s1068_s4 + $0x70] sm:$0xff]  ;;  %v194_v10 = vld [vmem:[%s1068_s4 + $0x78] sm:$0xff] }
  0x39   :  { %655 = vmatprep.subr.bf16.mxu0 %v654_v33  ;;  %v689_v8 = vpack.c.bf16 %v192_v7, %v191_v6  ;;  %v692_v11 = vpack.c.bf16 %v194_v10, %v193_v9  ;;  %v531_v14 = vld [vmem:[%s1067_s3] ss:$0 sm:$0xff]  ;;  %v283_v20 = vld [vmem:[%s1070_s6 + $0x8] sm:$0xff]  ;;  %v284_v27 = vld [vmem:[%s1070_s6 + $0x10] sm:$0xff] }
  0x3a   :  { %v282_v19 = vld [vmem:[%s1070_s6] sm:$0xff]  ;;  %v285_v28 = vld [vmem:[%s1070_s6 + $0x18] sm:$0xff]  ;;  %v369_v31 = vld [vmem:[#allocation5 + $0x8] sm:$0xff] }
  0x3b   :  { %678 = vmatpush3.bf16.msra.mxu1 %v677_v47  ;;  %v695_v21 = vpack.c.bf16 %v283_v20, %v282_v19  ;;  %v532_v22 = vld [vmem:[%s1069_s5] ss:$0 sm:$0xff]  ;;  %v698_v29 = vpack.c.bf16 %v285_v28, %v284_v27  ;;  %s856_s5 = smov 96   ;;  %v371_v32 = vld [vmem:[#allocation5 + $0x18] sm:$0xff]  ;;  %v370_v35 = vld [vmem:[#allocation5 + $0x10] sm:$0xff] }
  0x3c   :  { %657 = vmatpush3.bf16.msra.mxu0 %v656_v41  ;;  %679 = vmatprep.subr.bf16.mxu1 %v853_v0  ;;  %v368_v33 = vld [vmem:[#allocation5] sm:$0xff]  ;;  %v700_v34 = vpack.c.bf16 %v371_v32, %v369_v31  ;;  %v373_v36 = vld [vmem:[#allocation5 + $0x28] sm:$0xff]  ;;  %v375_v37 = vld [vmem:[#allocation5 + $0x38] sm:$0xff] }
  0x3d   :  { %659 = vmatprep.subr.bf16.mxu0 %v658_v42  ;;  %v702_v38 = vpack.c.bf16 %v370_v35, %v368_v33  ;;  %v704_v39 = vpack.c.bf16 %v375_v37, %v373_v36  ;;  %v372_v40 = vld [vmem:[#allocation5 + $0x20] sm:$0xff]  ;;  %v374_v41 = vld [vmem:[#allocation5 + $0x30] sm:$0xff]  ;;  %v377_v42 = vld [vmem:[#allocation5 + $0x48] sm:$0xff] }
  0x3e   :  { %v379_v43 = vld [vmem:[#allocation5 + $0x58] sm:$0xff]  ;;  %v706_v44 = vpack.c.bf16 %v374_v41, %v372_v40  ;;  %v376_v46 = vld [vmem:[#allocation5 + $0x40] sm:$0xff]  ;;  %v378_v47 = vld [vmem:[#allocation5 + $0x50] sm:$0xff] }
  0x3f   :  { %681 = vmatpush3.bf16.msra.mxu1 %v680_v56  ;;  %v708_v45 = vpack.c.bf16 %v379_v43, %v377_v42  ;;  %v272_v48 = vld [vmem:[%s1065_s1] sm:$0xff]  ;;  %v381_v49 = vld [vmem:[#allocation5 + $0x68] sm:$0xff]  ;;  %v710_v52 = vpack.c.bf16 %v378_v47, %v376_v46  ;;  %v382_v55 = vld [vmem:[#allocation5 + $0x70] sm:$0xff] }
  0x40   :  { %661 = vmatpush3.bf16.msra.mxu0 %v660_v50  ;;  %682 = vmatprep.subr.bf16.mxu1 %v853_v0  ;;  %v383_v50 = vld [vmem:[#allocation5 + $0x78] sm:$0xff]  ;;  %v380_v54 = vld [vmem:[#allocation5 + $0x60] sm:$0xff]  ;;  %v385_v57 = vld [vmem:[#allocation5 + $0x88] sm:$0xff] }
  0x41   :  { %663 = vmatprep.subr.bf16.mxu0 %v662_v51  ;;  %v712_v56 = vpack.c.bf16 %v383_v50, %v381_v49  ;;  %v387_v58 = vld [vmem:[#allocation5 + $0x98] sm:$0xff]  ;;  %v384_v62 = vld [vmem:[#allocation5 + $0x80] sm:$0xff]  ;;  %v389_v1 = vld [vmem:[#allocation5 + $0xa8] sm:$0xff] }
  0x42   :  { %v716_v61 = vpack.c.bf16 %v387_v58, %v385_v57  ;;  %v391_v2 = vld [vmem:[#allocation5 + $0xb8] sm:$0xff]  ;;  %v390_v6 = vld [vmem:[#allocation5 + $0xb0] sm:$0xff]  ;;  %v393_v7 = vld [vmem:[#allocation5 + $0xc8] sm:$0xff] }
  0x43   :  { %684 = vmatpush3.bf16.msra.mxu1 %v683_v63  ;;  %v386_v63 = vld [vmem:[#allocation5 + $0x90] sm:$0xff] }
  0x44   :  { %665 = vmatpush3.bf16.msra.mxu0 %v664_v59  ;;  %685 = vmatprep.subr.bf16.mxu1 %v853_v0 }
  0x45   :  { %667 = vmatprep.subr.bf16.mxu0 %v666_v60  ;;  %v714_v60 = vpack.c.bf16 %v382_v55, %v380_v54 }
  0x47   :  { %687 = vmatpush3.bf16.msra.mxu1 %v686_v4  ;;  %v720_v4 = vpack.c.bf16 %v391_v2, %v389_v1 }
  0x48   :  { %669 = vmatpush3.bf16.msra.mxu0 %v668_v3  ;;  %688 = vmatprep.subr.bf16.mxu1 %v853_v0  ;;  %v718_v3 = vpack.c.bf16 %v386_v63, %v384_v62 }
  0x49   :  { %694 = vmatprep.subr.bf16.mxu0 %v853_v0 }
  0x4b   :  { %173 = vmatmul.mubr.f32.vlgmr.msra.gmra.mrb[0].mxu0 %v67_v5  ;;  %690 = vmatpush3.bf16.msra.mxu1 %v689_v8  ;;  %v388_v5 = vld [vmem:[#allocation5 + $0xa0] sm:$0xff]  ;;  %v395_v8 = vld [vmem:[#allocation5 + $0xd8] sm:$0xff] }
  0x4c   :  { %691 = vmatprep.subr.bf16.mxu1 %v853_v0  ;;  %635 = vmatprep.mubr.msk.f32.mxu0 %vm854_vm0, %v855_v12  ;;  %v722_v9 = vpack.c.bf16 %v390_v6, %v388_v5  ;;  %v724_v10 = vpack.c.bf16 %v395_v8, %v393_v7 }
  0x4d   :  { %696 = vmatpush3.bf16.msra.mxu0 %v695_v21 }
  0x4e   :  { %697 = vmatprep.subr.bf16.mxu0 %v853_v0 }
  0x4f   :  { %693 = vmatpush3.bf16.msra.mxu1 %v692_v11  ;;  %v392_v11 = vld [vmem:[#allocation5 + $0xc0] sm:$0xff] }
  0x50   :  { %701 = vmatprep.subr.bf16.mxu1 %v700_v34 }
  0x51   :  { %699 = vmatpush3.bf16.msra.mxu0 %v698_v29 }
 0x11e   :  { %v567_v13 = vpop.f32.mrb[0].mxu0 }
 0x11f   :  { %v568_v15 = vpop.f32.mrb[1].mxu0 }
 0x120   :  { %v569_v16 = vadd.f32 %v568_v15, %v567_v13  ;;  %v399_v15 = vld [vmem:[#allocation5 + $0xf8] sm:$0xff] }
 0x122   :  { %v175_v17 = vadd.f32 %v569_v16, %v531_v14  ;;  %v397_v14 = vld [vmem:[#allocation5 + $0xe8] sm:$0xff] }
 0x123   :  { %v728_v16 = vpack.c.bf16 %v399_v15, %v397_v14 }
 0x124   :  { %v178_v18 = vmax.f32 %v175_v17, 0.0  ;;  %v396_v17 = vld [vmem:[#allocation5 + $0xe0] sm:$0xff] }
 0x126   :  { %625 = vmatmul.mubr.f32.vlgmr.msra.gmra.mrb[0].mxu1 %v178_v18  ;;  %v398_v18 = vld [vmem:[#allocation5 + $0xf0] sm:$0xff] }
 0x127   :  { %476 = vmatprep.mubr.f32.mxu1 %v855_v12  ;;  %703 = vmatpush1.bf16.msra.mxu1 %v702_v38  ;;  %v394_v12 = vld [vmem:[#allocation5 + $0xd0] sm:$0xff]  ;;  %v730_v19 = vpack.c.bf16 %v398_v18, %v396_v17 }
 0x128   :  { %705 = vmatprep.subr.bf16.mxu1 %v704_v39  ;;  %v726_v13 = vpack.c.bf16 %v394_v12, %v392_v11 }
 0x12b   :  { %707 = vmatpush1.bf16.msra.mxu1 %v706_v44 }
 0x12c   :  { %709 = vmatprep.subr.bf16.mxu1 %v708_v45 }
 0x12f   :  { %711 = vmatpush1.bf16.msra.mxu1 %v710_v52 }
 0x130   :  { %713 = vmatprep.subr.bf16.mxu1 %v712_v56 }
 0x133   :  { %715 = vmatpush1.bf16.msra.mxu1 %v714_v60 }
 0x134   :  { %717 = vmatprep.subr.bf16.mxu1 %v716_v61 }
 0x137   :  { %719 = vmatpush1.bf16.msra.mxu1 %v718_v3 }
 0x138   :  { %721 = vmatprep.subr.bf16.mxu1 %v720_v4 }
 0x13b   :  { %723 = vmatpush1.bf16.msra.mxu1 %v722_v9 }
 0x13c   :  { %725 = vmatprep.subr.bf16.mxu1 %v724_v10 }
 0x13f   :  { %727 = vmatpush1.bf16.msra.mxu1 %v726_v13 }
 0x140   :  { %729 = vmatprep.subr.bf16.mxu1 %v728_v16 }
 0x143   :  { %731 = vmatpush1.bf16.msra.mxu1 %v730_v19 }
 0x1f9   :  { %v268_v23 = vpop.f32.mrb[0].mxu1 }
 0x1fa   :  { %v1020_v24 = vadd.f32 %v532_v22, %v268_v23  ;;  %v626_v25 = vpop.f32.mrb[1].mxu1  ;;  %v533_v23 = vld [vmem:[%s1071_s7] ss:$0 sm:$0xff] }
 0x1fc   :  { %v273_v26 = vmul.f32 0.5, %v1020_v24 }
 0x1fe   :  { %v274_v0 = vmul.f32 1.442695, %v273_v26 }
 0x200   :  { %745 = vpow2.f32 %v274_v0 }
 0x20a   :  { %v746_v30 = vpop.eup %745 }
 0x20b   :  { %277 = vrot.lane.b32.xlu0 %v746_v30, %s856_s5 }
 0x27d   :  { %v278_v51 = vpop.permute.xlu0 %277 }
 0x27e   :  { %v280_v53 = vmul.f32 %v278_v51, %v272_v48 }
 0x280   :  { %v281_v59 = vadd.f32 %v280_v53, %v1020_v24 }
 0x282   :  { %493 = vrot.lane.b32.xlu0 %v281_v59, %s857_s28  ;;  %636 = vmatmul.mubr.msk.f32.vlgmr.msra.gmra.mrb[2].mxu0 %vm293_vm1, %v281_v59 }
 0x2f4   :  { %v494_v20 = vpop.permute.xlu0 %493 }
 0x2f5   :  { %v497_v21 = vsel %vm496_vm2, %v1020_v24, %v494_v20 }
 0x2f6   :  { %v499_v22 = vsel %vm498_vm3, %v497_v21, 0.0 }
 0x2f7   :  { %500 = vst [vmem:[#allocation8] sm:$0xff] %v499_v22 }
 0x355   :  { %v363_v25 = vpop.f32.mrb[2].mxu0 }
 0x356   :  { %v364_v26 = vadd.f32 %v533_v23, %v363_v25  ;;  %v637_v27 = vpop.f32.mrb[3].mxu0 }
 0x358   :  { %v367_v28 = vmax.f32 %v364_v26, 0.0 }
 0x35a   :  { %477 = vmatmul.mubr.f32.vlgmr.msra.gmra.mrb[2].mxu1 %v367_v28 }
 0x35b   :  { %806 = shalt.err (!%p803_p6)
}
 0x35c   :  { %s807_s16 = scalar_lea.hbm %s1075_s11, 128 }
 0x35d   :  { %p808_p7 = scmp.ne.s32.totalorder %s1075_s11, %s807_s16  ;;  %p811_p8 = scmp.lt.u32.totalorder %s807_s16, %s1075_s11 }
 0x35f   :  { %p813_p9 = pnand %p811_p8, %p808_p7 }
 0x361   :  { %816 = shalt.err (!%p813_p9)
}
 0x362   :  { %520 = dma.vmem_to_hbm [thread:$0]  %s518_s12, 128, %s1075_s11, [#allocation9]   ;;  %v402_v24 = vlaneseq  ;;  %v400_v30 = vld [vmem:[%s1073_s9] sm:$0x3] }
 0x363   :  { %s859_s11 = smov [#allocation7]  }
 0x364   :  { %v403_v29 = vshrl.u32 %v402_v24, 7  ;;  %s507_s4 = sshll.u32 %s859_s11, 4  ;;  %s508_s4 = int_to_ptr.vmem [resolvable:$true] %s507_s4 }
 0x365   :  { %s817_s9 = scalar_lea.vmem %s508_s4, 256  ;;  %p822_p11 = scmp.lt.s32.totalorder %s508_s4, %s508_s4 }
 0x366   :  { %v404_v0 = vsub.s32 0, %v403_v29  ;;  %v408_v31 = vsub.s32 1, %v403_v29  ;;  %p818_p10 = scmp.ne.s32.totalorder %s508_s4, %s817_s9  ;;  %p823_p12 = scmp.lt.s32.totalorder %s817_s9, %s817_s9 }
 0x368   :  { %v405_v32 = vrot.slane %v400_v30, %v404_v0  ;;  %v409_v33 = vrot.slane %v400_v30, %v408_v31  ;;  %p824_p13 = por %p823_p12, %p822_p11 }
 0x36a   :  { %p825_p0 = pnand %p824_p13, %p818_p10 }
 0x42d   :  { %v478_v34 = vpop.f32.mrb[2].mxu1 }
 0x42e   :  { %v479_v35 = vadd.f32 %v478_v34, %v405_v32  ;;  %v480_v36 = vpop.f32.mrb[3].mxu1 }
 0x42f   :  { %v481_v37 = vadd.f32 %v480_v36, %v409_v33 }
 0x430   :  { %v483_v38 = vmul.f32 0.5, %v479_v35 }
 0x431   :  { %v484_v39 = vmul.f32 0.5, %v481_v37 }
 0x432   :  { %747 = vtanh.f32 %v483_v38 }
 0x433   :  { %749 = vtanh.f32 %v484_v39 }
 0x43c   :  { %v748_v40 = vpop.eup %747 }
 0x43d   :  { %v750_v41 = vpop.eup %749  ;;  %v487_v42 = vadd.f32 1.0, %v748_v40 }
 0x43e   :  { %v488_v43 = vadd.f32 1.0, %v750_v41 }
 0x43f   :  { %v489_v44 = vmul.f32 0.5, %v487_v42 }
 0x440   :  { %v490_v45 = vmul.f32 0.5, %v488_v43 }
 0x441   :  { %491 = vst [vmem:[#allocation7] sm:$0xff] %v489_v44 }
 0x442   :  { %492 = vst [vmem:[#allocation7 + $0x8] sm:$0xff] %v490_v45 }
 0x443   :  { %828 = shalt.err (!%p825_p0)
}
 0x444   :  { %s829_s3 = scalar_lea.hbm %s1074_s10, 256 }
 0x445   :  { %p830_p1 = scmp.ne.s32.totalorder %s1074_s10, %s829_s3  ;;  %p833_p2 = scmp.lt.u32.totalorder %s829_s3, %s1074_s10 }
 0x447   :  { %p835_p3 = pnand %p833_p2, %p830_p1 }
 0x449   :  { %838 = shalt.err (!%p835_p3)
}
 0x44a   :  { %510 = dma.vmem_to_hbm [thread:$0]  %s508_s4, 256, %s1074_s10, [#allocation4]  }
 0x44b   :  { %843 = dma.done.wait [#allocation4], 256  }
 0x44c   :  { %844 = vsyncadd [#allocation4], 4294967040 }
 0x44d   :  { %845 = dma.done.wait [#allocation9], 128  }
 0x44e   :  { %846 = vsyncadd [#allocation9], 4294967168 }
 0x44f   :  { %527 = vsyncpa [#allocation3], 1 }
 0x450   :  { %528 = vsyncpa [#allocation6], 1 }
 0x451   :  { %529 = vsyncpa [#allocation4], 1 }
 0x452   :  { %530 = vsyncpa [#allocation9], 1 }

</bundles_post_ra>
